<compile_context>
chip_gen: v6e
topology: v6e:2x2x1
jax: 0.10.0
libtpu: 0.0.40
codegen_flags: <defaults>
</compile_context>

<pallas_src>
import numpy as np
import jax
import jax.numpy as jnp
from jax import lax
from jax.experimental import pallas as pl
from jax.experimental.pallas import tpu as pltpu


def _product_kernel_body(x1a_ref, x1b_ref, x2at_ref, x2bt_ref, o_ref):
    """One (tn, tm) output tile:
       K = clamp(x1a @ x2a^T, 0) * clamp(x1b @ x2b^T, 0)
    x2 slices arrive pre-transposed, so both dots are plain (tn,K)@(K,tm) MXU calls;
    clamp + elementwise product run on the VPU."""
    # component kernel 0: Distance1._sq_dist on active_dims_0, then clamp_min_(0)
    k0 = jnp.dot(x1a_ref[...], x2at_ref[...], preferred_element_type=jnp.float32)
    # component kernel 1: same on active_dims_1
    k1 = jnp.dot(x1b_ref[...], x2bt_ref[...], preferred_element_type=jnp.float32)
    # ProductKernel.forward: res = res * next_term (elementwise)
    o_ref[...] = (jnp.maximum(k0, 0.0) * jnp.maximum(k1, 0.0)).astype(o_ref.dtype)


def _select_cols(x, idx):
    """Column select for active_dims: contiguous runs become a cheap slice,
    arbitrary index sets fall back to a gather (matches index_select semantics)."""
    idx_np = np.asarray(idx)
    if idx_np.size > 0 and np.all(np.diff(idx_np) == 1):
        start = int(idx_np[0])
        return lax.slice_in_dim(x, start, start + int(idx_np.size), axis=1)
    return jnp.take(x, jnp.asarray(idx_np, dtype=jnp.int32), axis=1)


def product_kernel(x1, x2, active_dims_0, active_dims_1, *, tn=256, tm=512):
    """ProductKernel(kern0, kern1)(x1, x2) with diag=False.

    Glue (plain JAX, one-time): active_dims selection + transpose of the x2 slices.
    Hot path (Pallas): per-tile Gram matmuls, clamp, elementwise product, store.
    """
    # TODO(synk): diag=True path (per-row product of diagonal terms) not implemented.
    x1 = jnp.asarray(x1, jnp.float32)
    x2 = jnp.asarray(x2, jnp.float32)

    x1a = _select_cols(x1, active_dims_0)
    x1b = _select_cols(x1, active_dims_1)
    # Pre-transpose x2 slices once in XLA so the kernel never transposes per step.
    x2at = _select_cols(x2, active_dims_0).T   # (Da, M)
    x2bt = _select_cols(x2, active_dims_1).T   # (Db, M)

    N, Da = x1a.shape
    Db = x1b.shape[1]
    M = x2.shape[0]

    # Clamp tiles to the array extents (full-extent blocks are always legal);
    # otherwise keep tn a multiple of 8 and tm a multiple of 128 (lane-dense stores).
    tn = min(tn, N)
    tm = min(tm, M)
    grid = (pl.cdiv(N, tn), pl.cdiv(M, tm))

    return pl.pallas_call(
        _product_kernel_body,
        out_shape=jax.ShapeDtypeStruct((N, M), jnp.float32),
        grid=grid,
        in_specs=[
            # x1 slices: tiled along N, constant across the M axis
            pl.BlockSpec((tn, Da), lambda i, j: (i, 0)),
            pl.BlockSpec((tn, Db), lambda i, j: (i, 0)),
            # pre-transposed x2 slices: tiled along M, constant across the N axis
            pl.BlockSpec((Da, tm), lambda i, j: (0, j)),
            pl.BlockSpec((Db, tm), lambda i, j: (0, j)),
        ],
        out_specs=pl.BlockSpec((tn, tm), lambda i, j: (i, j)),
        compiler_params=pltpu.CompilerParams(
            dimension_semantics=("parallel", "parallel"),
            vmem_limit_bytes=32 * 1024 * 1024,
        ),
    )(x1a, x1b, x2at, x2bt)


def product_kernel_reference(x1, x2, active_dims_0, active_dims_1):
    """Pure-JAX reference mirroring the PyTorch module semantics."""
    x1 = jnp.asarray(x1, jnp.float32)
    x2 = jnp.asarray(x2, jnp.float32)
    x1a, x1b = x1[:, active_dims_0], x1[:, active_dims_1]
    x2a, x2b = x2[:, active_dims_0], x2[:, active_dims_1]
    k0 = jnp.maximum(x1a @ x2a.T, 0.0)
    k1 = jnp.maximum(x1b @ x2b.T, 0.0)
    return k0 * k1


if __name__ == "__main__":
    key = jax.random.PRNGKey(0)
    k1, k2, k3, k4 = jax.random.split(key, 4)

    # Primary check: small shapes consistent with the module (n x d inputs).
    N, M, D = 64, 48, 32
    x1 = jax.random.normal(k1, (N, D), dtype=jnp.float32)
    x2 = jax.random.normal(k2, (M, D), dtype=jnp.float32)

    # deterministic "active_dims" for the two component kernels: split features in half
    active_dims_0 = jnp.arange(0, D // 2)
    active_dims_1 = jnp.arange(D // 2, D)

    out = jax.block_until_ready(product_kernel(x1, x2, active_dims_0, active_dims_1))
    ref = product_kernel_reference(x1, x2, active_dims_0, active_dims_1)
    assert out.shape == (N, M)
    assert jnp.allclose(out, ref, atol=1e-4, rtol=1e-4), "mismatch vs reference"

    # Ragged-shape check: exercises the cdiv grid + masked partial tiles.
    N2, M2 = 200, 136
    x1r = jax.random.normal(k3, (N2, D), dtype=jnp.float32)
    x2r = jax.random.normal(k4, (M2, D), dtype=jnp.float32)
    out_r = jax.block_until_ready(
        product_kernel(x1r, x2r, active_dims_0, active_dims_1, tn=64, tm=128))
    ref_r = product_kernel_reference(x1r, x2r, active_dims_0, active_dims_1)
    assert out_r.shape == (N2, M2)
    assert jnp.allclose(out_r, ref_r, atol=1e-4, rtol=1e-4), "ragged mismatch vs reference"

    print("KERNEL_OK")
</pallas_src>

<mosaic_0001>
module attributes {stable_mosaic.version = 11 : i64} {
  func.func @_product_kernel_body(%arg0: i32, %arg1: i32, %arg2: memref<64x16xf32, #tpu.memory_space<vmem>>, %arg3: memref<64x16xf32, #tpu.memory_space<vmem>>, %arg4: memref<16x48xf32, #tpu.memory_space<vmem>>, %arg5: memref<16x48xf32, #tpu.memory_space<vmem>>, %arg6: memref<64x48xf32, #tpu.memory_space<vmem>>) attributes {dimension_semantics = [#tpu.dimension_semantics<parallel>, #tpu.dimension_semantics<parallel>], iteration_bounds = array<i64: 1, 1>, scalar_prefetch = 0 : i64, scratch_operands = 0 : i64, tpu.core_type = #tpu.core_type<tc>, window_params = [{transform_indices = @transform_0, window_bounds = array<i64: 64, 16>}, {transform_indices = @transform_1, window_bounds = array<i64: 64, 16>}, {transform_indices = @transform_2, window_bounds = array<i64: 16, 48>}, {transform_indices = @transform_3, window_bounds = array<i64: 16, 48>}, {transform_indices = @transform_4, window_bounds = array<i64: 64, 48>}]} {
    %c0 = arith.constant 0 : index
    %c0_0 = arith.constant 0 : index
    %0 = vector.load %arg2[%c0, %c0_0] : memref<64x16xf32, #tpu.memory_space<vmem>>, vector<64x16xf32>
    %c0_1 = arith.constant 0 : index
    %c0_2 = arith.constant 0 : index
    %1 = vector.load %arg4[%c0_1, %c0_2] : memref<16x48xf32, #tpu.memory_space<vmem>>, vector<16x48xf32>
    %cst = arith.constant dense<0.000000e+00> : vector<64x48xf32>
    %2 = tpu.matmul %0, %1, %cst {dimension_numbers = #tpu.dot_dimension_numbers<[1], [0], [0], [1], [0, 0, 1, 1], [], []>} : vector<64x16xf32>, vector<16x48xf32>, vector<64x48xf32> -> vector<64x48xf32>
    %c0_3 = arith.constant 0 : index
    %c0_4 = arith.constant 0 : index
    %3 = vector.load %arg3[%c0_3, %c0_4] : memref<64x16xf32, #tpu.memory_space<vmem>>, vector<64x16xf32>
    %c0_5 = arith.constant 0 : index
    %c0_6 = arith.constant 0 : index
    %4 = vector.load %arg5[%c0_5, %c0_6] : memref<16x48xf32, #tpu.memory_space<vmem>>, vector<16x48xf32>
    %cst_7 = arith.constant dense<0.000000e+00> : vector<64x48xf32>
    %5 = tpu.matmul %3, %4, %cst_7 {dimension_numbers = #tpu.dot_dimension_numbers<[1], [0], [0], [1], [0, 0, 1, 1], [], []>} : vector<64x16xf32>, vector<16x48xf32>, vector<64x48xf32> -> vector<64x48xf32>
    %cst_8 = arith.constant 0.000000e+00 : f32
    %6 = vector.broadcast %cst_8 : f32 to vector<64x48xf32>
    %7 = arith.maximumf %2, %6 : vector<64x48xf32>
    %cst_9 = arith.constant 0.000000e+00 : f32
    %8 = vector.broadcast %cst_9 : f32 to vector<64x48xf32>
    %9 = arith.maximumf %5, %8 : vector<64x48xf32>
    %10 = arith.mulf %7, %9 : vector<64x48xf32>
    %c0_10 = arith.constant 0 : index
    %c0_11 = arith.constant 0 : index
    %11 = vector.load %arg6[%c0_10, %c0_11] : memref<64x48xf32, #tpu.memory_space<vmem>>, vector<64x48xf32>
    tpu.vector_store %arg6[%c0_10, %c0_11], %10 {strides = array<i32>} : memref<64x48xf32, #tpu.memory_space<vmem>>, vector<64x48xf32>,
    return
  }
  func.func @transform_0(%arg0: i32, %arg1: i32) -> (i32, i32) {
    %c0_i32 = arith.constant 0 : i32
    %c0_i32_0 = arith.constant 0 : i32
    return %arg0, %c0_i32 : i32, i32
  }
  func.func @transform_1(%arg0: i32, %arg1: i32) -> (i32, i32) {
    %c0_i32 = arith.constant 0 : i32
    %c0_i32_0 = arith.constant 0 : i32
    return %arg0, %c0_i32 : i32, i32
  }
  func.func @transform_2(%arg0: i32, %arg1: i32) -> (i32, i32) {
    %c0_i32 = arith.constant 0 : i32
    %c0_i32_0 = arith.constant 0 : i32
    return %c0_i32, %arg1 : i32, i32
  }
  func.func @transform_3(%arg0: i32, %arg1: i32) -> (i32, i32) {
    %c0_i32 = arith.constant 0 : i32
    %c0_i32_0 = arith.constant 0 : i32
    return %c0_i32, %arg1 : i32, i32
  }
  func.func @transform_4(%arg0: i32, %arg1: i32) -> (i32, i32) {
    %c0_i32 = arith.constant 0 : i32
    return %arg0, %arg1 : i32, i32
  }
}

</mosaic_0001>

<bundles_post_ra>
// kernel: tpu_custom_call.1
= control target key start
LH: loop header
LB: loop body
LE: loop exit
PB: predicated region body
PF: predicated region fallthrough
CT: control target
= control target key end

     0   :  { %vm27_vm0 = vcmask 130048   ;;  %vm320_vm1 = vcmask 392192   ;;  %s534_s2 = inlined_call_operand.vmem [shape: f32[16,48], index: 2, kind: input, shape index: {}]   ;;  %s535_s3 = inlined_call_operand.vmem [shape: f32[16,48], index: 3, kind: input, shape index: {}]   ;;  %s536_s0 = inlined_call_operand.vmem [shape: f32[64,16], index: 0, kind: input, shape index: {}]   ;;  %s537_s1 = inlined_call_operand.vmem [shape: f32[64,16], index: 1, kind: input, shape index: {}]   ;;  %s538_s4 = inlined_call_operand.vmem [shape: f32[64,48], index: 4, kind: output, shape index: {}]  }
   0x1   :  { %v26_v0 = vld [vmem:[%s534_s2 + $0x8] sm:$0xff]  ;;  %v25_v2 = vld [vmem:[%s534_s2] sm:$0xff]  ;;  %v19_v8 = vld [vmem:[%s536_s0 + $0x10] sm:$0xff] }
   0x2   :  { %v166_v1 = vld [vmem:[%s535_s3 + $0x8] sm:$0xff]  ;;  %369 = vmatprep.subr.mxu0 %v26_v0  ;;  %v165_v3 = vld [vmem:[%s535_s3] sm:$0xff]  ;;  %v159_v9 = vld [vmem:[%s537_s1 + $0x10] sm:$0xff] }
   0x3   :  { %385 = vmatprep.subr.mxu1 %v166_v1  ;;  %v17_v4 = vld [vmem:[%s536_s0] sm:$0xff]  ;;  %370 = vmatpush3.msra.mxu0 %v26_v0  ;;  %v18_v6 = vld [vmem:[%s536_s0 + $0x8] sm:$0xff]  ;;  %v20_v10 = vld [vmem:[%s536_s0 + $0x18] sm:$0xff] }
   0x4   :  { %386 = vmatpush3.msra.mxu1 %v166_v1  ;;  %v157_v5 = vld [vmem:[%s537_s1] sm:$0xff]  ;;  %371 = vmatprep.subr.mxu0 %v25_v2  ;;  %v158_v7 = vld [vmem:[%s537_s1 + $0x8] sm:$0xff]  ;;  %v160_v11 = vld [vmem:[%s537_s1 + $0x18] sm:$0xff] }
   0x5   :  { %387 = vmatprep.subr.mxu1 %v165_v3  ;;  %372 = vmatpush3.msra.mxu0 %v25_v2  ;;  %v21_v12 = vld [vmem:[%s536_s0 + $0x20] sm:$0xff]  ;;  %v22_v14 = vld [vmem:[%s536_s0 + $0x28] sm:$0xff]  ;;  %v23_v16 = vld [vmem:[%s536_s0 + $0x30] sm:$0xff] }
   0x6   :  { %373 = vmatprep.mubr.msk.f32.mxu0 %vm27_vm0, %v17_v4  ;;  %388 = vmatpush3.msra.mxu1 %v165_v3  ;;  %v161_v13 = vld [vmem:[%s537_s1 + $0x20] sm:$0xff]  ;;  %v162_v15 = vld [vmem:[%s537_s1 + $0x28] sm:$0xff]  ;;  %v163_v17 = vld [vmem:[%s537_s1 + $0x30] sm:$0xff] }
   0x7   :  { %389 = vmatprep.mubr.msk.f32.mxu1 %vm27_vm0, %v157_v5  ;;  %374 = vmatmul.mubr.msk.f32.vlgmr.msra.gmra.mxu0 %vm27_vm0, %v18_v6  ;;  %v24_v18 = vld [vmem:[%s536_s0 + $0x38] sm:$0xff] }
   0x8   :  { %390 = vmatmul.mubr.msk.f32.vlgmr.msra.gmra.mxu1 %vm27_vm0, %v158_v7  ;;  %376 = vmatprep.mubr.msk.f32.mxu0 %vm27_vm0, %v19_v8  ;;  %v164_v19 = vld [vmem:[%s537_s1 + $0x38] sm:$0xff] }
   0x9   :  { %392 = vmatprep.mubr.msk.f32.mxu1 %vm27_vm0, %v159_v9 }
   0xb   :  { %377 = vmatmul.mubr.msk.f32.gmra.mxu0 %vm27_vm0, %v20_v10 }
   0xc   :  { %393 = vmatmul.mubr.msk.f32.gmra.mxu1 %vm27_vm0, %v160_v11  ;;  %379 = vmatprep.mubr.msk.f32.mxu0 %vm27_vm0, %v21_v12 }
   0xd   :  { %395 = vmatprep.mubr.msk.f32.mxu1 %vm27_vm0, %v161_v13 }
   0xf   :  { %380 = vmatmul.mubr.msk.f32.gmra.mxu0 %vm27_vm0, %v22_v14 }
  0x10   :  { %396 = vmatmul.mubr.msk.f32.gmra.mxu1 %vm27_vm0, %v162_v15  ;;  %382 = vmatprep.mubr.msk.f32.mxu0 %vm27_vm0, %v23_v16 }
  0x11   :  { %398 = vmatprep.mubr.msk.f32.mxu1 %vm27_vm0, %v163_v17 }
  0x13   :  { %383 = vmatmul.mubr.msk.f32.gmra.mxu0 %vm27_vm0, %v24_v18 }
  0x14   :  { %399 = vmatmul.mubr.msk.f32.gmra.mxu1 %vm27_vm0, %v164_v19 }
  0xc7   :  { %v375_v20 = vpop.f32.mrf.mxu0 }
  0xc8   :  { %v391_v21 = vpop.f32.mrf.mxu1  ;;  %v297_v22 = vmax.f32 %v375_v20, 0.0 }
  0xc9   :  { %v305_v23 = vmax.f32 %v391_v21, 0.0  ;;  %v118_v24 = vpop.f32.mrf.mxu0 }
  0xca   :  { %v257_v25 = vpop.f32.mrf.mxu1  ;;  %v296_v27 = vmax.f32 %v118_v24, 0.0 }
  0xcb   :  { %v313_v26 = vmul.f32 %v305_v23, %v297_v22  ;;  %v304_v28 = vmax.f32 %v257_v25, 0.0  ;;  %v378_v29 = vpop.f32.mrf.mxu0 }
  0xcc   :  { %v394_v30 = vpop.f32.mrf.mxu1  ;;  %v299_v32 = vmax.f32 %v378_v29, 0.0 }
  0xcd   :  { %322 = vst.msk [vmem:[%s538_s4 + $0x8] sm:$0xff] %vm320_vm1, %v313_v26  ;;  %v312_v31 = vmul.f32 %v304_v28, %v296_v27  ;;  %v307_v33 = vmax.f32 %v394_v30, 0.0  ;;  %v128_v34 = vpop.f32.mrf.mxu0 }
  0xce   :  { %v267_v35 = vpop.f32.mrf.mxu1  ;;  %v298_v37 = vmax.f32 %v128_v34, 0.0 }
  0xcf   :  { %321 = vst.msk [vmem:[%s538_s4] sm:$0xff] %vm320_vm1, %v312_v31  ;;  %v315_v36 = vmul.f32 %v307_v33, %v299_v32  ;;  %v306_v38 = vmax.f32 %v267_v35, 0.0  ;;  %v381_v39 = vpop.f32.mrf.mxu0 }
  0xd0   :  { %v397_v40 = vpop.f32.mrf.mxu1  ;;  %v301_v42 = vmax.f32 %v381_v39, 0.0 }
  0xd1   :  { %324 = vst.msk [vmem:[%s538_s4 + $0x18] sm:$0xff] %vm320_vm1, %v315_v36  ;;  %v314_v41 = vmul.f32 %v306_v38, %v298_v37  ;;  %v309_v43 = vmax.f32 %v397_v40, 0.0  ;;  %v138_v44 = vpop.f32.mrf.mxu0 }
  0xd2   :  { %v277_v45 = vpop.f32.mrf.mxu1  ;;  %v300_v47 = vmax.f32 %v138_v44, 0.0 }
  0xd3   :  { %323 = vst.msk [vmem:[%s538_s4 + $0x10] sm:$0xff] %vm320_vm1, %v314_v41  ;;  %v317_v46 = vmul.f32 %v309_v43, %v301_v42  ;;  %v308_v48 = vmax.f32 %v277_v45, 0.0  ;;  %v384_v49 = vpop.f32.mrf.mxu0 }
  0xd4   :  { %v400_v50 = vpop.f32.mrf.mxu1  ;;  %v303_v52 = vmax.f32 %v384_v49, 0.0 }
  0xd5   :  { %326 = vst.msk [vmem:[%s538_s4 + $0x28] sm:$0xff] %vm320_vm1, %v317_v46  ;;  %v316_v51 = vmul.f32 %v308_v48, %v300_v47  ;;  %v311_v53 = vmax.f32 %v400_v50, 0.0  ;;  %v148_v54 = vpop.f32.mrf.mxu0 }
  0xd6   :  { %v287_v55 = vpop.f32.mrf.mxu1  ;;  %v302_v57 = vmax.f32 %v148_v54, 0.0 }
  0xd7   :  { %325 = vst.msk [vmem:[%s538_s4 + $0x20] sm:$0xff] %vm320_vm1, %v316_v51  ;;  %v319_v56 = vmul.f32 %v311_v53, %v303_v52  ;;  %v310_v58 = vmax.f32 %v287_v55, 0.0 }
  0xd9   :  { %328 = vst.msk [vmem:[%s538_s4 + $0x38] sm:$0xff] %vm320_vm1, %v319_v56  ;;  %v318_v59 = vmul.f32 %v310_v58, %v302_v57 }
  0xdb   :  { %327 = vst.msk [vmem:[%s538_s4 + $0x30] sm:$0xff] %vm320_vm1, %v318_v59 }

</bundles_post_ra>
